<compile_context>
chip_gen: v7x
topology: tpu7x:2x2x1
jax: 0.10.0
libtpu: 0.0.40
codegen_flags: <defaults>
</compile_context>

<pallas_src>
import functools

import jax
import jax.numpy as jnp
from jax.experimental import pallas as pl
from jax.experimental.pallas import tpu as pltpu

LANE = 128
SUBLANE = 8
_LN_EPS = 1e-6


def _round_up(n, m):
    return (n + m - 1) // m * m


# --------------------------------------------------------------------------
# One-time capability probes
# --------------------------------------------------------------------------
def _probe_copy_kernel(x_ref, o_ref):
    o_ref[...] = x_ref[...]


@functools.lru_cache(maxsize=None)
def _buffered_weights_supported():
    """Probe once whether pipeline_mode=pl.Buffered(1) lowers on this build.

    Grid-invariant weights want single-buffering (halves their VMEM footprint,
    which matters on v7x's 64 MiB/TC).  Probing once avoids wrapping the real
    pallas_call in a broad except that could swallow genuine lowering errors.
    """
    try:
        spec = pl.BlockSpec((SUBLANE, LANE), lambda i: (0, 0),
                            pipeline_mode=pl.Buffered(1))
        fn = pl.pallas_call(
            _probe_copy_kernel,
            out_shape=jax.ShapeDtypeStruct((SUBLANE, LANE), jnp.float32),
            grid_spec=pltpu.PrefetchScalarGridSpec(
                num_scalar_prefetch=0, grid=(1,), in_specs=[spec],
                out_specs=pl.BlockSpec((SUBLANE, LANE), lambda i: (0, 0))),
        )
        jax.block_until_ready(fn(jnp.zeros((SUBLANE, LANE), jnp.float32)))
        return True
    except Exception:  # capability probe only; the real call is NOT guarded
        return False


@functools.lru_cache(maxsize=None)
def _vmem_cap_bytes():
    """Generation-aware VMEM request ceiling (headroom for Mosaic scratch)."""
    try:
        cap = int(pltpu.get_tpu_info().vmem_capacity_bytes)
    except Exception:
        cap = 64 * 2 ** 20  # conservative default: v7x per-TC capacity
    return max(int(cap * 0.75), 16 * 2 ** 20)


# --------------------------------------------------------------------------
# Kernels
# --------------------------------------------------------------------------
def _ln_modulate_mlp(x, g, b, shift, scale, gate,
                     w1_ref, b1_ref, w2_ref, b2_ref, o_ref, c_true):
    """Shared LN -> modulate -> MLP -> gated residual tail (f32 VPU math)."""
    cp = x.shape[-1]
    inv_c = 1.0 / float(c_true)
    # LayerNorm over the TRUE channel count (padded lanes of x are zero).
    mu = jnp.sum(x, axis=-1, keepdims=True) * inv_c
    xc = x - mu
    if cp != c_true:  # lane padding present: mask pad lanes for the variance
        lane = jax.lax.broadcasted_iota(jnp.int32, x.shape, x.ndim - 1)
        xc = jnp.where(lane < c_true, xc, 0.0)
    var = jnp.sum(xc * xc, axis=-1, keepdims=True) * inv_c   # stable two-pass var
    xn = xc * jax.lax.rsqrt(var + _LN_EPS) * g + b

    h = xn * (1.0 + scale) + shift
    h1 = jnp.dot(h.astype(w1_ref.dtype), w1_ref[...],
                 preferred_element_type=jnp.float32) + b1_ref[...]
    h1 = h1 * jax.nn.sigmoid(h1)                               # SiLU
    h2 = jnp.dot(h1.astype(w2_ref.dtype), w2_ref[...],
                 preferred_element_type=jnp.float32) + b2_ref[...]

    # TODO(synk): use_post_norm=True branch (extra LayerNorm on gate*h2) not wired in.
    o_ref[...] = (x + gate * h2).astype(o_ref.dtype)


def _resblock_kernel_split(x_ref, y_ref, g_ref, b_ref,
                           ws_ref, wsc_ref, wg_ref, bs_ref, bsc_ref, bg_ref,
                           w1_ref, b1_ref, w2_ref, b2_ref, o_ref, *, c_true):
    """adaLN weights pre-split into shift/scale/gate (used when C % 128 != 0)."""
    x = x_ref[...].astype(jnp.float32)
    y = y_ref[...].astype(jnp.float32)
    y_silu = (y * jax.nn.sigmoid(y)).astype(ws_ref.dtype)
    shift = jnp.dot(y_silu, ws_ref[...], preferred_element_type=jnp.float32) + bs_ref[...]
    scale = jnp.dot(y_silu, wsc_ref[...], preferred_element_type=jnp.float32) + bsc_ref[...]
    gate = jnp.dot(y_silu, wg_ref[...], preferred_element_type=jnp.float32) + bg_ref[...]
    _ln_modulate_mlp(x, g_ref[...], b_ref[...], shift, scale, gate,
                     w1_ref, b1_ref, w2_ref, b2_ref, o_ref, c_true)


def _resblock_kernel_fused(x_ref, y_ref, g_ref, b_ref, wa_ref, ba_ref,
                           w1_ref, b1_ref, w2_ref, b2_ref, o_ref, *, c_true):
    """Single [TM,C]x[C,3C] adaLN MXU pass; f32 result sliced at 128-aligned
    offsets.  Only used when C % 128 == 0 (all slices lane-aligned, no pad)."""
    x = x_ref[...].astype(jnp.float32)
    y = y_ref[...].astype(jnp.float32)
    y_silu = (y * jax.nn.sigmoid(y)).astype(wa_ref.dtype)
    mod = jnp.dot(y_silu, wa_ref[...], preferred_element_type=jnp.float32) + ba_ref[...]
    c = c_true
    shift, scale, gate = mod[:, :c], mod[:, c:2 * c], mod[:, 2 * c:]
    _ln_modulate_mlp(x, g_ref[...], b_ref[...], shift, scale, gate,
                     w1_ref, b1_ref, w2_ref, b2_ref, o_ref, c_true)


# --------------------------------------------------------------------------
# Parameter preparation (one-time cast / split / lane-pad)
# --------------------------------------------------------------------------
def prepare_params(params, *, matmul_dtype=jnp.bfloat16):
    """Cast matmul weights, split/pad the adaLN projection, lane-pad to 128.

    Call once and reuse the result across forward calls so per-call wrappers
    emit no weight convert / slice HBM traffic.
    """
    C = params["mlp_w1"].shape[0]
    Cp = _round_up(C, LANE)
    fused = (C % LANE == 0)   # fused adaLN only when result slices are lane-aligned
    f32 = jnp.float32

    def row(v, n):
        v = jnp.asarray(v).reshape(1, -1).astype(f32)
        return jnp.pad(v, ((0, 0), (0, n - v.shape[1]))) if v.shape[1] != n else v

    def mat(w, r, c):
        w = jnp.asarray(w).astype(matmul_dtype)
        pr, pc = r - w.shape[0], c - w.shape[1]
        return jnp.pad(w, ((0, pr), (0, pc))) if (pr or pc) else w

    prep = {
        "C": C, "Cp": Cp, "fused": fused, "matmul_dtype": jnp.dtype(matmul_dtype),
        "ln_gamma": row(params["ln_gamma"], Cp),
        "ln_beta": row(params["ln_beta"], Cp),
        "mlp_w1": mat(params["mlp_w1"], Cp, Cp),
        "mlp_b1": row(params["mlp_b1"], Cp),
        "mlp_w2": mat(params["mlp_w2"], Cp, Cp),
        "mlp_b2": row(params["mlp_b2"], Cp),
    }
    wa, ba = params["ada_w"], params["ada_b"]
    if fused:
        prep["ada_w"] = mat(wa, Cp, 3 * Cp)
        prep["ada_b"] = row(ba, 3 * Cp)
    else:
        prep["ada_w_shift"] = mat(wa[:, :C], Cp, Cp)
        prep["ada_w_scale"] = mat(wa[:, C:2 * C], Cp, Cp)
        prep["ada_w_gate"] = mat(wa[:, 2 * C:], Cp, Cp)
        prep["ada_b_shift"] = row(ba[:C], Cp)
        prep["ada_b_scale"] = row(ba[C:2 * C], Cp)
        prep["ada_b_gate"] = row(ba[2 * C:], Cp)
    return prep


# --------------------------------------------------------------------------
# Forward wrapper
# --------------------------------------------------------------------------
def resblock_forward(x, y, params, *, block_rows=256, matmul_dtype=jnp.bfloat16):
    """ResBlock forward (use_post_norm=False).  x, y: [..., C].

    `params` may be raw (init_params layout) or already prepared via
    prepare_params(); pass prepared params when calling repeatedly.
    """
    prep = params if "Cp" in params else prepare_params(params, matmul_dtype=matmul_dtype)
    C, Cp, fused = prep["C"], prep["Cp"], prep["fused"]
    w_dtype = prep["matmul_dtype"]

    orig_shape = x.shape
    assert orig_shape[-1] == C, "channel dim mismatch with params"
    x2 = x.reshape(-1, C)
    y2 = y.reshape(-1, C)
    N = x2.shape[0]

    # Row tile: MXU-friendly; never shrunk just to manufacture extra grid
    # steps (a single grid step beats 8-row LHS tiles on the 256-wide MXU).
    tm = _round_up(min(block_rows, _round_up(N, SUBLANE)), SUBLANE)
    Np = _round_up(N, tm)

    # Pad rows to a tile multiple and channels to a 128 multiple so the output
    # store is lane-dense (unmasked vst) on every generation.
    if Np != N or Cp != C:
        x2 = jnp.pad(x2, ((0, Np - N), (0, Cp - C)))
        y2 = jnp.pad(y2, ((0, Np - N), (0, Cp - C)))

    single_buf = _buffered_weights_supported()
    wkw = {"pipeline_mode": pl.Buffered(1)} if single_buf else {}
    row_spec = pl.BlockSpec((tm, Cp), lambda i: (i, 0))

    def full(shape):
        return pl.BlockSpec(shape, lambda i: (0, 0), **wkw)

    if fused:
        kernel = functools.partial(_resblock_kernel_fused, c_true=C)
        weight_args = (prep["ada_w"], prep["ada_b"],
                       prep["mlp_w1"], prep["mlp_b1"],
                       prep["mlp_w2"], prep["mlp_b2"])
        weight_specs = [full((Cp, 3 * Cp)), full((1, 3 * Cp)),
                        full((Cp, Cp)), full((1, Cp)),
                        full((Cp, Cp)), full((1, Cp))]
    else:
        kernel = functools.partial(_resblock_kernel_split, c_true=C)
        weight_args = (prep["ada_w_shift"], prep["ada_w_scale"], prep["ada_w_gate"],
                       prep["ada_b_shift"], prep["ada_b_scale"], prep["ada_b_gate"],
                       prep["mlp_w1"], prep["mlp_b1"],
                       prep["mlp_w2"], prep["mlp_b2"])
        weight_specs = [full((Cp, Cp)), full((Cp, Cp)), full((Cp, Cp)),
                        full((1, Cp)), full((1, Cp)), full((1, Cp)),
                        full((Cp, Cp)), full((1, Cp)),
                        full((Cp, Cp)), full((1, Cp))]

    # VMEM budget: weights counted once if single-buffered, row tiles
    # double-buffered, plus live f32 intermediates.  Clamp to the real
    # generation capacity (64 MiB/TC on v7x) with headroom.
    w_item = jnp.dtype(w_dtype).itemsize
    act_item = jnp.dtype(x2.dtype).itemsize
    weight_bytes = 5 * Cp * Cp * w_item + 9 * Cp * 4
    weight_bufs = 1 if single_buf else 2
    io_tile_bytes = 3 * tm * Cp * act_item                  # x, y, out tiles
    live_f32 = 8 * tm * Cp * 4                              # in-kernel intermediates
    est = 2 * io_tile_bytes + weight_bufs * weight_bytes + live_f32
    vmem_limit = int(min(max(int(1.25 * est), 16 * 2 ** 20), _vmem_cap_bytes()))
    # TODO(synk): for very large C (5*Cp^2 weight bytes near the VMEM cap,
    # ~C>1536 on v7x) switch to an output-column weight-slab loop with a VMEM
    # accumulator instead of fully resident weights.

    cost = pl.CostEstimate(
        flops=10 * Np * Cp * Cp,                            # 5 [N,C]x[C,C]-equiv matmuls
        transcendentals=2 * Np * Cp + Np,                   # two SiLUs + rsqrt per row
        bytes_accessed=3 * Np * Cp * act_item + weight_bytes,
    )

    out = pl.pallas_call(
        kernel,
        out_shape=jax.ShapeDtypeStruct((Np, Cp), x.dtype),
        grid_spec=pltpu.PrefetchScalarGridSpec(
            num_scalar_prefetch=0,
            grid=(Np // tm,),
            in_specs=[row_spec, row_spec,
                      full((1, Cp)), full((1, Cp))] + weight_specs,
            out_specs=row_spec,
        ),
        compiler_params=pltpu.CompilerParams(
            dimension_semantics=("parallel",),
            vmem_limit_bytes=vmem_limit),
        cost_estimate=cost,
    )(x2, y2, prep["ln_gamma"], prep["ln_beta"], *weight_args)

    return out[:N, :C].reshape(orig_shape)


# --------------------------------------------------------------------------
# Reference + test harness
# --------------------------------------------------------------------------
def init_params(key, channels):
    """Deterministic synthetic init (shapes match the nn.Module __init__)."""
    ks = jax.random.split(key, 6)
    s = 0.02
    return {
        "ln_gamma": jnp.ones((channels,), jnp.float32),
        "ln_beta": jnp.zeros((channels,), jnp.float32),
        "ada_w": s * jax.random.normal(ks[0], (channels, 3 * channels), jnp.float32),
        "ada_b": s * jax.random.normal(ks[1], (3 * channels,), jnp.float32),
        "mlp_w1": s * jax.random.normal(ks[2], (channels, channels), jnp.float32),
        "mlp_b1": s * jax.random.normal(ks[3], (channels,), jnp.float32),
        "mlp_w2": s * jax.random.normal(ks[4], (channels, channels), jnp.float32),
        "mlp_b2": s * jax.random.normal(ks[5], (channels,), jnp.float32),
    }


def resblock_reference(x, y, p):
    """Pure-JAX reference (HIGHEST matmul precision) for correctness checks."""
    hp = jax.lax.Precision.HIGHEST
    silu = lambda v: v * jax.nn.sigmoid(v)
    mod = jnp.dot(silu(y), p["ada_w"], precision=hp) + p["ada_b"]
    shift, scale, gate = jnp.split(mod, 3, axis=-1)
    mu = jnp.mean(x, axis=-1, keepdims=True)
    var = jnp.mean(jnp.square(x - mu), axis=-1, keepdims=True)
    xn = (x - mu) / jnp.sqrt(var + 1e-6) * p["ln_gamma"] + p["ln_beta"]
    h = xn * (1.0 + scale) + shift
    h = jnp.dot(silu(jnp.dot(h, p["mlp_w1"], precision=hp) + p["mlp_b1"]),
                p["mlp_w2"], precision=hp) + p["mlp_b2"]
    return x + gate * h


if __name__ == "__main__":
    key = jax.random.PRNGKey(0)
    kx, ky, kp, kp2 = jax.random.split(key, 4)

    # --- small-C case (C=32 < 128): exercises lane padding + masked LN ------
    batch, seq, channels = 2, 8, 32     # N = 16 tokens
    x = jax.random.normal(kx, (batch, seq, channels), jnp.float32)
    y = jax.random.normal(ky, (batch, seq, channels), jnp.float32)
    params = init_params(kp, channels)
    ref = resblock_reference(x, y, params)

    # Exact-math path (f32 MXU operands) — tight check.
    prep_f32 = prepare_params(params, matmul_dtype=jnp.float32)
    out_f32 = jax.block_until_ready(resblock_forward(x, y, prep_f32))
    assert out_f32.shape == x.shape
    assert jnp.allclose(out_f32, ref, atol=1e-4, rtol=1e-4), "f32 mismatch vs reference"

    # Performance path (bf16 MXU operands, f32 accumulation) — loose check.
    prep_bf16 = prepare_params(params)                    # weights prepared once
    out_bf16 = jax.block_until_ready(resblock_forward(x, y, prep_bf16))
    assert jnp.allclose(out_bf16, ref, atol=2e-2, rtol=2e-2), "bf16 mismatch vs reference"

    # Ragged token count (row-padding path), exact math, reused prepared params.
    xr, yr = x[:, :7, :], y[:, :7, :]
    out_r = jax.block_until_ready(resblock_forward(xr, yr, prep_f32))
    assert jnp.allclose(out_r, resblock_reference(xr, yr, params),
                        atol=1e-4, rtol=1e-4), "ragged mismatch vs reference"

    # --- lane-aligned case (C=128): exercises the fused adaLN kernel --------
    channels2 = 128
    x2 = jax.random.normal(kx, (batch, seq, channels2), jnp.float32)
    y2 = jax.random.normal(ky, (batch, seq, channels2), jnp.float32)
    params2 = init_params(kp2, channels2)
    prep2 = prepare_params(params2, matmul_dtype=jnp.float32)
    out2 = jax.block_until_ready(resblock_forward(x2, y2, prep2))
    assert jnp.allclose(out2, resblock_reference(x2, y2, params2),
                        atol=1e-4, rtol=1e-4), "fused-adaLN mismatch vs reference"

    print("KERNEL_OK")
</pallas_src>

<mosaic_0001>
module attributes {stable_mosaic.version = 11 : i64} {
  func.func @_probe_copy_kernel(%arg0: i32, %arg1: memref<8x128xf32, #tpu.memory_space<vmem>>, %arg2: memref<8x128xf32, #tpu.memory_space<vmem>>) attributes {dimension_semantics = [#tpu.dimension_semantics<arbitrary>], iteration_bounds = array<i64: 1>, scalar_prefetch = 0 : i64, scratch_operands = 0 : i64, tpu.core_type = #tpu.core_type<tc>, window_params = [{pipeline_mode = #tpu.pipeline_mode<synchronous>, transform_indices = @transform_0, window_bounds = array<i64: 8, 128>}, {pipeline_mode = #tpu.pipeline_mode<synchronous>, transform_indices = @transform_1, window_bounds = array<i64: 8, 128>}]} {
    %c0 = arith.constant 0 : index
    %c0_0 = arith.constant 0 : index
    %0 = vector.load %arg1[%c0, %c0_0] : memref<8x128xf32, #tpu.memory_space<vmem>>, vector<8x128xf32>
    %c0_1 = arith.constant 0 : index
    %c0_2 = arith.constant 0 : index
    %1 = vector.load %arg2[%c0_1, %c0_2] : memref<8x128xf32, #tpu.memory_space<vmem>>, vector<8x128xf32>
    tpu.vector_store %arg2[%c0_1, %c0_2], %0 {strides = array<i32>} : memref<8x128xf32, #tpu.memory_space<vmem>>, vector<8x128xf32>,
    return
  }
  func.func @transform_0(%arg0: i32) -> (i32, i32) {
    %c0_i32 = arith.constant 0 : i32
    %c0_i32_0 = arith.constant 0 : i32
    %c0_i32_1 = arith.constant 0 : i32
    return %c0_i32, %c0_i32_0 : i32, i32
  }
  func.func @transform_1(%arg0: i32) -> (i32, i32) {
    %c0_i32 = arith.constant 0 : i32
    %c0_i32_0 = arith.constant 0 : i32
    %c0_i32_1 = arith.constant 0 : i32
    return %c0_i32, %c0_i32_0 : i32, i32
  }
}

module attributes {stable_mosaic.version = 11 : i64} {
  func.func @_resblock_kernel_split(%arg0: i32, %arg1: memref<16x128xf32, #tpu.memory_space<vmem>>, %arg2: memref<16x128xf32, #tpu.memory_space<vmem>>, %arg3: memref<1x128xf32, #tpu.memory_space<vmem>>, %arg4: memref<1x128xf32, #tpu.memory_space<vmem>>, %arg5: memref<128x128xf32, #tpu.memory_space<vmem>>, %arg6: memref<128x128xf32, #tpu.memory_space<vmem>>, %arg7: memref<128x128xf32, #tpu.memory_space<vmem>>, %arg8: memref<1x128xf32, #tpu.memory_space<vmem>>, %arg9: memref<1x128xf32, #tpu.memory_space<vmem>>, %arg10: memref<1x128xf32, #tpu.memory_space<vmem>>, %arg11: memref<128x128xf32, #tpu.memory_space<vmem>>, %arg12: memref<1x128xf32, #tpu.memory_space<vmem>>, %arg13: memref<128x128xf32, #tpu.memory_space<vmem>>, %arg14: memref<1x128xf32, #tpu.memory_space<vmem>>, %arg15: memref<16x128xf32, #tpu.memory_space<vmem>>) attributes {dimension_semantics = [#tpu.dimension_semantics<parallel>], iteration_bounds = array<i64: 1>, scalar_prefetch = 0 : i64, scratch_operands = 0 : i64, tpu.core_type = #tpu.core_type<tc>, window_params = [{transform_indices = @transform_0, window_bounds = array<i64: 16, 128>}, {transform_indices = @transform_1, window_bounds = array<i64: 16, 128>}, {pipeline_mode = #tpu.pipeline_mode<synchronous>, transform_indices = @transform_2, window_bounds = array<i64: 1, 128>}, {pipeline_mode = #tpu.pipeline_mode<synchronous>, transform_indices = @transform_3, window_bounds = array<i64: 1, 128>}, {pipeline_mode = #tpu.pipeline_mode<synchronous>, transform_indices = @transform_4, window_bounds = array<i64: 128, 128>}, {pipeline_mode = #tpu.pipeline_mode<synchronous>, transform_indices = @transform_5, window_bounds = array<i64: 128, 128>}, {pipeline_mode = #tpu.pipeline_mode<synchronous>, transform_indices = @transform_6, window_bounds = array<i64: 128, 128>}, {pipeline_mode = #tpu.pipeline_mode<synchronous>, transform_indices = @transform_7, window_bounds = array<i64: 1, 128>}, {pipeline_mode = #tpu.pipeline_mode<synchronous>, transform_indices = @transform_8, window_bounds = array<i64: 1, 128>}, {pipeline_mode = #tpu.pipeline_mode<synchronous>, transform_indices = @transform_9, window_bounds = array<i64: 1, 128>}, {pipeline_mode = #tpu.pipeline_mode<synchronous>, transform_indices = @transform_10, window_bounds = array<i64: 128, 128>}, {pipeline_mode = #tpu.pipeline_mode<synchronous>, transform_indices = @transform_11, window_bounds = array<i64: 1, 128>}, {pipeline_mode = #tpu.pipeline_mode<synchronous>, transform_indices = @transform_12, window_bounds = array<i64: 128, 128>}, {pipeline_mode = #tpu.pipeline_mode<synchronous>, transform_indices = @transform_13, window_bounds = array<i64: 1, 128>}, {transform_indices = @transform_14, window_bounds = array<i64: 16, 128>}]} {
    %c0 = arith.constant 0 : index
    %c0_0 = arith.constant 0 : index
    %0 = vector.load %arg1[%c0, %c0_0] : memref<16x128xf32, #tpu.memory_space<vmem>>, vector<16x128xf32>
    %c0_1 = arith.constant 0 : index
    %c0_2 = arith.constant 0 : index
    %1 = vector.load %arg2[%c0_1, %c0_2] : memref<16x128xf32, #tpu.memory_space<vmem>>, vector<16x128xf32>
    %2 = arith.negf %1 : vector<16x128xf32>
    %3 = math.exp %2 : vector<16x128xf32>
    %cst = arith.constant 1.000000e+00 : f32
    %4 = vector.broadcast %cst : f32 to vector<16x128xf32>
    %5 = arith.addf %4, %3 : vector<16x128xf32>
    %6 = arith.divf %4, %5 : vector<16x128xf32>
    %7 = arith.mulf %1, %6 : vector<16x128xf32>
    %c0_3 = arith.constant 0 : index
    %c0_4 = arith.constant 0 : index
    %8 = vector.load %arg5[%c0_3, %c0_4] : memref<128x128xf32, #tpu.memory_space<vmem>>, vector<128x128xf32>
    %cst_5 = arith.constant dense<0.000000e+00> : vector<16x128xf32>
    %9 = tpu.matmul %7, %8, %cst_5 {dimension_numbers = #tpu.dot_dimension_numbers<[1], [0], [0], [1], [0, 0, 1, 1], [], []>} : vector<16x128xf32>, vector<128x128xf32>, vector<16x128xf32> -> vector<16x128xf32>
    %c0_6 = arith.constant 0 : index
    %c0_7 = arith.constant 0 : index
    %10 = vector.load %arg8[%c0_6, %c0_7] : memref<1x128xf32, #tpu.memory_space<vmem>>, vector<1x128xf32>
    %11 = vector.broadcast %10 : vector<1x128xf32> to vector<16x128xf32>
    %12 = arith.addf %9, %11 : vector<16x128xf32>
    %c0_8 = arith.constant 0 : index
    %c0_9 = arith.constant 0 : index
    %13 = vector.load %arg6[%c0_8, %c0_9] : memref<128x128xf32, #tpu.memory_space<vmem>>, vector<128x128xf32>
    %cst_10 = arith.constant dense<0.000000e+00> : vector<16x128xf32>
    %14 = tpu.matmul %7, %13, %cst_10 {dimension_numbers = #tpu.dot_dimension_numbers<[1], [0], [0], [1], [0, 0, 1, 1], [], []>} : vector<16x128xf32>, vector<128x128xf32>, vector<16x128xf32> -> vector<16x128xf32>
    %c0_11 = arith.constant 0 : index
    %c0_12 = arith.constant 0 : index
    %15 = vector.load %arg9[%c0_11, %c0_12] : memref<1x128xf32, #tpu.memory_space<vmem>>, vector<1x128xf32>
    %16 = vector.broadcast %15 : vector<1x128xf32> to vector<16x128xf32>
    %17 = arith.addf %14, %16 : vector<16x128xf32>
    %c0_13 = arith.constant 0 : index
    %c0_14 = arith.constant 0 : index
    %18 = vector.load %arg7[%c0_13, %c0_14] : memref<128x128xf32, #tpu.memory_space<vmem>>, vector<128x128xf32>
    %cst_15 = arith.constant dense<0.000000e+00> : vector<16x128xf32>
    %19 = tpu.matmul %7, %18, %cst_15 {dimension_numbers = #tpu.dot_dimension_numbers<[1], [0], [0], [1], [0, 0, 1, 1], [], []>} : vector<16x128xf32>, vector<128x128xf32>, vector<16x128xf32> -> vector<16x128xf32>
    %c0_16 = arith.constant 0 : index
    %c0_17 = arith.constant 0 : index
    %20 = vector.load %arg10[%c0_16, %c0_17] : memref<1x128xf32, #tpu.memory_space<vmem>>, vector<1x128xf32>
    %21 = vector.broadcast %20 : vector<1x128xf32> to vector<16x128xf32>
    %22 = arith.addf %19, %21 : vector<16x128xf32>
    %c0_18 = arith.constant 0 : index
    %c0_19 = arith.constant 0 : index
    %23 = vector.load %arg3[%c0_18, %c0_19] : memref<1x128xf32, #tpu.memory_space<vmem>>, vector<1x128xf32>
    %c0_20 = arith.constant 0 : index
    %c0_21 = arith.constant 0 : index
    %24 = vector.load %arg4[%c0_20, %c0_21] : memref<1x128xf32, #tpu.memory_space<vmem>>, vector<1x128xf32>
    %cst_22 = arith.constant dense<0.000000e+00> : vector<16xf32>
    %25 = vector.multi_reduction <add>, %0, %cst_22 [1] : vector<16x128xf32> to vector<16xf32>
    %26 = vector.shape_cast %25 : vector<16xf32> to vector<16x1xf32>
    %cst_23 = arith.constant 3.125000e-02 : f32
    %27 = vector.broadcast %cst_23 : f32 to vector<16x1xf32>
    %28 = arith.mulf %26, %27 : vector<16x1xf32>
    %29 = vector.broadcast %28 : vector<16x1xf32> to vector<16x128xf32>
    %30 = arith.subf %0, %29 : vector<16x128xf32>
    %31 = tpu.iota {dimensions = array<i32: 1>} : vector<16x128xi32>
    %c32_i32 = arith.constant 32 : i32
    %32 = vector.broadcast %c32_i32 : i32 to vector<16x128xi32>
    %33 = arith.cmpi slt, %31, %32 : vector<16x128xi32>
    %cst_24 = arith.constant 0.000000e+00 : f32
    %34 = vector.broadcast %cst_24 : f32 to vector<16x128xf32>
    %35 = arith.select %33, %30, %34 : vector<16x128xi1>, vector<16x128xf32>
    %36 = arith.mulf %35, %35 : vector<16x128xf32>
    %cst_25 = arith.constant dense<0.000000e+00> : vector<16xf32>
    %37 = vector.multi_reduction <add>, %36, %cst_25 [1] : vector<16x128xf32> to vector<16xf32>
    %38 = vector.shape_cast %37 : vector<16xf32> to vector<16x1xf32>
    %cst_26 = arith.constant 3.125000e-02 : f32
    %39 = vector.broadcast %cst_26 : f32 to vector<16x1xf32>
    %40 = arith.mulf %38, %39 : vector<16x1xf32>
    %cst_27 = arith.constant 9.99999997E-7 : f32
    %41 = vector.broadcast %cst_27 : f32 to vector<16x1xf32>
    %42 = arith.addf %40, %41 : vector<16x1xf32>
    %43 = math.rsqrt %42 : vector<16x1xf32>
    %44 = vector.broadcast %43 : vector<16x1xf32> to vector<16x128xf32>
    %45 = arith.mulf %35, %44 : vector<16x128xf32>
    %46 = vector.broadcast %23 : vector<1x128xf32> to vector<16x128xf32>
    %47 = arith.mulf %45, %46 : vector<16x128xf32>
    %48 = vector.broadcast %24 : vector<1x128xf32> to vector<16x128xf32>
    %49 = arith.addf %47, %48 : vector<16x128xf32>
    %cst_28 = arith.constant 1.000000e+00 : f32
    %50 = vector.broadcast %cst_28 : f32 to vector<16x128xf32>
    %51 = arith.addf %50, %17 : vector<16x128xf32>
    %52 = arith.mulf %49, %51 : vector<16x128xf32>
    %53 = arith.addf %52, %12 : vector<16x128xf32>
    %c0_29 = arith.constant 0 : index
    %c0_30 = arith.constant 0 : index
    %54 = vector.load %arg11[%c0_29, %c0_30] : memref<128x128xf32, #tpu.memory_space<vmem>>, vector<128x128xf32>
    %cst_31 = arith.constant dense<0.000000e+00> : vector<16x128xf32>
    %55 = tpu.matmul %53, %54, %cst_31 {dimension_numbers = #tpu.dot_dimension_numbers<[1], [0], [0], [1], [0, 0, 1, 1], [], []>} : vector<16x128xf32>, vector<128x128xf32>, vector<16x128xf32> -> vector<16x128xf32>
    %c0_32 = arith.constant 0 : index
    %c0_33 = arith.constant 0 : index
    %56 = vector.load %arg12[%c0_32, %c0_33] : memref<1x128xf32, #tpu.memory_space<vmem>>, vector<1x128xf32>
    %57 = vector.broadcast %56 : vector<1x128xf32> to vector<16x128xf32>
    %58 = arith.addf %55, %57 : vector<16x128xf32>
    %59 = arith.negf %58 : vector<16x128xf32>
    %60 = math.exp %59 : vector<16x128xf32>
    %cst_34 = arith.constant 1.000000e+00 : f32
    %61 = vector.broadcast %cst_34 : f32 to vector<16x128xf32>
    %62 = arith.addf %61, %60 : vector<16x128xf32>
    %63 = arith.divf %61, %62 : vector<16x128xf32>
    %64 = arith.mulf %58, %63 : vector<16x128xf32>
    %c0_35 = arith.constant 0 : index
    %c0_36 = arith.constant 0 : index
    %65 = vector.load %arg13[%c0_35, %c0_36] : memref<128x128xf32, #tpu.memory_space<vmem>>, vector<128x128xf32>
    %cst_37 = arith.constant dense<0.000000e+00> : vector<16x128xf32>
    %66 = tpu.matmul %64, %65, %cst_37 {dimension_numbers = #tpu.dot_dimension_numbers<[1], [0], [0], [1], [0, 0, 1, 1], [], []>} : vector<16x128xf32>, vector<128x128xf32>, vector<16x128xf32> -> vector<16x128xf32>
    %c0_38 = arith.constant 0 : index
    %c0_39 = arith.constant 0 : index
    %67 = vector.load %arg14[%c0_38, %c0_39] : memref<1x128xf32, #tpu.memory_space<vmem>>, vector<1x128xf32>
    %68 = vector.broadcast %67 : vector<1x128xf32> to vector<16x128xf32>
    %69 = arith.addf %66, %68 : vector<16x128xf32>
    %70 = arith.mulf %22, %69 : vector<16x128xf32>
    %71 = arith.addf %0, %70 : vector<16x128xf32>
    %c0_40 = arith.constant 0 : index
    %c0_41 = arith.constant 0 : index
    %72 = vector.load %arg15[%c0_40, %c0_41] : memref<16x128xf32, #tpu.memory_space<vmem>>, vector<16x128xf32>
    tpu.vector_store %arg15[%c0_40, %c0_41], %71 {strides = array<i32>} : memref<16x128xf32, #tpu.memory_space<vmem>>, vector<16x128xf32>,
    return
  }
  func.func @transform_0(%arg0: i32) -> (i32, i32) {
    %c0_i32 = arith.constant 0 : i32
    %c0_i32_0 = arith.constant 0 : i32
    return %arg0, %c0_i32 : i32, i32
  }
  func.func @transform_1(%arg0: i32) -> (i32, i32) {
    %c0_i32 = arith.constant 0 : i32
    %c0_i32_0 = arith.constant 0 : i32
    return %arg0, %c0_i32 : i32, i32
  }
  func.func @transform_2(%arg0: i32) -> (i32, i32) {
    %c0_i32 = arith.constant 0 : i32
    %c0_i32_0 = arith.constant 0 : i32
    %c0_i32_1 = arith.constant 0 : i32
    return %c0_i32, %c0_i32_0 : i32, i32
  }
  func.func @transform_3(%arg0: i32) -> (i32, i32) {
    %c0_i32 = arith.constant 0 : i32
    %c0_i32_0 = arith.constant 0 : i32
    %c0_i32_1 = arith.constant 0 : i32
    return %c0_i32, %c0_i32_0 : i32, i32
  }
  func.func @transform_4(%arg0: i32) -> (i32, i32) {
    %c0_i32 = arith.constant 0 : i32
    %c0_i32_0 = arith.constant 0 : i32
    %c0_i32_1 = arith.constant 0 : i32
    return %c0_i32, %c0_i32_0 : i32, i32
  }
  func.func @transform_5(%arg0: i32) -> (i32, i32) {
    %c0_i32 = arith.constant 0 : i32
    %c0_i32_0 = arith.constant 0 : i32
    %c0_i32_1 = arith.constant 0 : i32
    return %c0_i32, %c0_i32_0 : i32, i32
  }
  func.func @transform_6(%arg0: i32) -> (i32, i32) {
    %c0_i32 = arith.constant 0 : i32
    %c0_i32_0 = arith.constant 0 : i32
    %c0_i32_1 = arith.constant 0 : i32
    return %c0_i32, %c0_i32_0 : i32, i32
  }
  func.func @transform_7(%arg0: i32) -> (i32, i32) {
    %c0_i32 = arith.constant 0 : i32
    %c0_i32_0 = arith.constant 0 : i32
    %c0_i32_1 = arith.constant 0 : i32
    return %c0_i32, %c0_i32_0 : i32, i32
  }
  func.func @transform_8(%arg0: i32) -> (i32, i32) {
    %c0_i32 = arith.constant 0 : i32
    %c0_i32_0 = arith.constant 0 : i32
    %c0_i32_1 = arith.constant 0 : i32
    return %c0_i32, %c0_i32_0 : i32, i32
  }
  func.func @transform_9(%arg0: i32) -> (i32, i32) {
    %c0_i32 = arith.constant 0 : i32
    %c0_i32_0 = arith.constant 0 : i32
    %c0_i32_1 = arith.constant 0 : i32
    return %c0_i32, %c0_i32_0 : i32, i32
  }
  func.func @transform_10(%arg0: i32) -> (i32, i32) {
    %c0_i32 = arith.constant 0 : i32
    %c0_i32_0 = arith.constant 0 : i32
    %c0_i32_1 = arith.constant 0 : i32
    return %c0_i32, %c0_i32_0 : i32, i32
  }
  func.func @transform_11(%arg0: i32) -> (i32, i32) {
    %c0_i32 = arith.constant 0 : i32
    %c0_i32_0 = arith.constant 0 : i32
    %c0_i32_1 = arith.constant 0 : i32
    return %c0_i32, %c0_i32_0 : i32, i32
  }
  func.func @transform_12(%arg0: i32) -> (i32, i32) {
    %c0_i32 = arith.constant 0 : i32
    %c0_i32_0 = arith.constant 0 : i32
    %c0_i32_1 = arith.constant 0 : i32
    return %c0_i32, %c0_i32_0 : i32, i32
  }
  func.func @transform_13(%arg0: i32) -> (i32, i32) {
    %c0_i32 = arith.constant 0 : i32
    %c0_i32_0 = arith.constant 0 : i32
    %c0_i32_1 = arith.constant 0 : i32
    return %c0_i32, %c0_i32_0 : i32, i32
  }
  func.func @transform_14(%arg0: i32) -> (i32, i32) {
    %c0_i32 = arith.constant 0 : i32
    %c0_i32_0 = arith.constant 0 : i32
    return %arg0, %c0_i32 : i32, i32
  }
}

</mosaic_0001>

<bundles_post_ra>
// kernel: tpu_custom_call.1
= control target key start
LH: loop header
LB: loop body
LE: loop exit
PB: predicated region body
PF: predicated region fallthrough
CT: control target
= control target key end

     0   :  { %6 = vsyncpa [#allocation3], 0  ;;  %s124_s0 = inlined_call_operand.hbm [shape: f32[8,128], index: 0, kind: input, shape index: {}]   ;;  %s125_s1 = inlined_call_operand.hbm [shape: f32[8,128], index: 1, kind: output, shape index: {}]  }
   0x1   :  { %7 = vsyncpa [#allocation4], 0  ;;  %s88_s6 = smov [#allocation2]   ;;  %s40_s10 = scalar_lea.hbm %s124_s0, 128 }
   0x2   :  { %s14_s7 = sshll.u32 %s88_s6, 4  ;;  %p41_p0 = scmp.ne.s32.totalorder %s124_s0, %s40_s10  ;;  %s15_s7 = int_to_ptr.vmem [resolvable:$true] %s14_s7 }
   0x3   :  { %p44_p1 = scmp.lt.u32.totalorder %s40_s10, %s124_s0 }
   0x5   :  { %p46_p2 = pnand %p44_p1, %p41_p0 }
   0x7   :  { %49 = shalt.err (!%p46_p2)
}
   0x8   :  { %s50_s15 = scalar_lea.vmem %s15_s7, 128  ;;  %p55_p4 = scmp.lt.s32.totalorder %s15_s7, %s15_s7 }
   0x9   :  { %p51_p3 = scmp.ne.s32.totalorder %s15_s7, %s50_s15  ;;  %p56_p5 = scmp.lt.s32.totalorder %s50_s15, %s50_s15 }
   0xb   :  { %p57_p6 = por %p56_p5, %p55_p4 }
   0xd   :  { %p58_p7 = pnand %p57_p6, %p51_p3 }
   0xf   :  { %61 = shalt.err (!%p58_p7)
}
  0x10   :  { %17 = dma.hbm_to_vmem [thread:$0]  %s124_s0, 128, %s15_s7, [#allocation3]  }
  0x11   :  { %84 = dma.done.wait [#allocation3], 128  }
  0x12   :  { %85 = vsyncadd [#allocation3], 4294967168  ;;  %s89_s18 = smov [#allocation5]   ;;  %v21_v0 = vld [vmem:[#allocation2] sm:$0xff] }
  0x13   :  { %s29_s19 = sshll.u32 %s89_s18, 4  ;;  %22 = vst [vmem:[#allocation5] sm:$0xff] %v21_v0  ;;  %s30_s19 = int_to_ptr.vmem [resolvable:$true] %s29_s19 }
  0x14   :  { %s62_s20 = scalar_lea.vmem %s30_s19, 128  ;;  %p67_p9 = scmp.lt.s32.totalorder %s30_s19, %s30_s19 }
  0x15   :  { %p63_p8 = scmp.ne.s32.totalorder %s30_s19, %s62_s20  ;;  %p68_p10 = scmp.lt.s32.totalorder %s62_s20, %s62_s20 }
  0x17   :  { %p69_p11 = por %p68_p10, %p67_p9 }
  0x19   :  { %p70_p12 = pnand %p69_p11, %p63_p8 }
  0x1b   :  { %73 = shalt.err (!%p70_p12)
}
  0x1c   :  { %s74_s23 = scalar_lea.hbm %s125_s1, 128 }
  0x1d   :  { %p75_p13 = scmp.ne.s32.totalorder %s125_s1, %s74_s23  ;;  %p78_p0 = scmp.lt.u32.totalorder %s74_s23, %s125_s1 }
  0x1f   :  { %p80_p1 = pnand %p78_p0, %p75_p13 }
  0x21   :  { %83 = shalt.err (!%p80_p1)
}
  0x22   :  { %32 = dma.vmem_to_hbm [thread:$0]  %s30_s19, 128, %s125_s1, [#allocation4]  }
  0x23   :  { %86 = dma.done.wait [#allocation4], 128  }
  0x24   :  { %87 = vsyncadd [#allocation4], 4294967168 }
  0x25   :  { %36 = vsyncpa [#allocation3], 1 }
  0x26   :  { %37 = vsyncpa [#allocation4], 1 }

// kernel: tpu_custom_call.1
= control target key start
LH: loop header
LB: loop body
LE: loop exit
PB: predicated region body
PF: predicated region fallthrough
CT: control target
= control target key end

     0   :  { %19 = vsyncpa [#allocation3], 0  ;;  %s1670_s0 = inlined_call_operand.hbm [shape: f32[16,128], index: 0, kind: input, shape index: {}]   ;;  %s1671_s1 = inlined_call_operand.hbm [shape: f32[16,128], index: 1, kind: input, shape index: {}]   ;;  %s1672_s2 = inlined_call_operand.vmem [shape: f32[1,128], index: 2, kind: input, shape index: {}]   ;;  %s1673_s3 = inlined_call_operand.vmem [shape: f32[1,128], index: 3, kind: input, shape index: {}]   ;;  %s1674_s4 = inlined_call_operand.hbm [shape: f32[128,128], index: 4, kind: input, shape index: {}]   ;;  %s1675_s5 = inlined_call_operand.hbm [shape: f32[128,128], index: 5, kind: input, shape index: {}]   ;;  %s1676_s6 = inlined_call_operand.hbm [shape: f32[128,128], index: 6, kind: input, shape index: {}]   ;;  %s1677_s7 = inlined_call_operand.vmem [shape: f32[1,128], index: 7, kind: input, shape index: {}]   ;;  %s1678_s8 = inlined_call_operand.vmem [shape: f32[1,128], index: 8, kind: input, shape index: {}]   ;;  %s1679_s9 = inlined_call_operand.vmem [shape: f32[1,128], index: 9, kind: input, shape index: {}]   ;;  %s1680_s10 = inlined_call_operand.hbm [shape: f32[128,128], index: 10, kind: input, shape index: {}]   ;;  %s1681_s11 = inlined_call_operand.vmem [shape: f32[1,128], index: 11, kind: input, shape index: {}]   ;;  %s1682_s12 = inlined_call_operand.hbm [shape: f32[128,128], index: 12, kind: input, shape index: {}]   ;;  %s1683_s13 = inlined_call_operand.vmem [shape: f32[1,128], index: 13, kind: input, shape index: {}]   ;;  %s1684_s14 = inlined_call_operand.hbm [shape: f32[16,128], index: 14, kind: output, shape index: {}]  }
   0x1   :  { %20 = vsyncpa [#allocation6], 0 }
   0x2   :  { %21 = vsyncpa [#allocation9], 0 }
   0x3   :  { %22 = vsyncpa [#allocation12], 0 }
   0x4   :  { %23 = vsyncpa [#allocation4], 0  ;;  %s1394_s29 = smov [#allocation5]   ;;  %s1395_s15 = smov [#allocation8]  }
   0x5   :  { %s41_s30 = sshll.u32 %s1394_s29, 4  ;;  %s69_s16 = sshll.u32 %s1395_s15, 4  ;;  %s42_s30 = int_to_ptr.vmem [resolvable:$true] %s41_s30  ;;  %s1479_s16 = int_to_ptr.vmem [resolvable:$true] %s69_s16 }
   0x6   :  { %s1208_s19 = scalar_lea.hbm %s1671_s1, 256 }
   0x7   :  { %p1209_p0 = scmp.ne.s32.totalorder %s1671_s1, %s1208_s19  ;;  %p1212_p1 = scmp.lt.u32.totalorder %s1208_s19, %s1671_s1 }
   0x9   :  { %p1214_p2 = pnand %p1212_p1, %p1209_p0 }
   0xb   :  { %1217 = shalt.err (!%p1214_p2)
}
   0xc   :  { %s1218_s24 = scalar_lea.vmem %s42_s30, 256  ;;  %p1223_p4 = scmp.lt.s32.totalorder %s42_s30, %s42_s30 }
   0xd   :  { %p1219_p3 = scmp.ne.s32.totalorder %s42_s30, %s1218_s24  ;;  %p1224_p5 = scmp.lt.s32.totalorder %s1218_s24, %s1218_s24 }
   0xf   :  { %p1225_p6 = por %p1224_p5, %p1223_p4 }
  0x11   :  { %p1226_p7 = pnand %p1225_p6, %p1219_p3 }
  0x13   :  { %1229 = shalt.err (!%p1226_p7)
}
  0x14   :  { %s1396_s25 = smov 128   ;;  %s1397_s26 = smov 8  }
  0x15   :  { %47 = dma.hbm_to_vmem [thread:$0]  %s1671_s1, 256, %s42_s30, [#allocation6], %s1396_s25, %s1396_s25, %s1397_s26  }
  0x16   :  { %s1230_s17 = scalar_lea.hbm %s1675_s5, 2048 }
  0x17   :  { %p1231_p8 = scmp.ne.s32.totalorder %s1675_s5, %s1230_s17  ;;  %p1234_p9 = scmp.lt.u32.totalorder %s1230_s17, %s1675_s5 }
  0x19   :  { %p1236_p10 = pnand %p1234_p9, %p1231_p8 }
  0x1b   :  { %1239 = shalt.err (!%p1236_p10)
}
  0x1c   :  { %s1240_s22 = scalar_lea.vmem %s1479_s16, 2048  ;;  %p1245_p12 = scmp.lt.s32.totalorder %s1479_s16, %s1479_s16 }
  0x1d   :  { %p1241_p11 = scmp.ne.s32.totalorder %s1479_s16, %s1240_s22  ;;  %p1246_p13 = scmp.lt.s32.totalorder %s1240_s22, %s1240_s22 }
  0x1f   :  { %p1247_p0 = por %p1246_p13, %p1245_p12 }
  0x21   :  { %p1248_p1 = pnand %p1247_p0, %p1241_p11 }
  0x23   :  { %1251 = shalt.err (!%p1248_p1)
}
  0x24   :  { %75 = dma.hbm_to_vmem [thread:$0]  %s1675_s5, 2048, %s1479_s16, [#allocation9], %s1396_s25, %s1396_s25, %s1397_s26  }
  0x25   :  { %s1398_s23 = smov [#allocation11]   ;;  %s1399_s27 = smov [#allocation2]  }
  0x26   :  { %s99_s24 = sshll.u32 %s1398_s23, 4  ;;  %s29_s28 = sshll.u32 %s1399_s27, 4  ;;  %s100_s24 = int_to_ptr.vmem [resolvable:$true] %s99_s24  ;;  %s1516_s28 = int_to_ptr.vmem [resolvable:$true] %s29_s28 }
  0x27   :  { %s1252_s17 = scalar_lea.hbm %s1680_s10, 2048 }
  0x28   :  { %p1253_p2 = scmp.ne.s32.totalorder %s1680_s10, %s1252_s17  ;;  %p1256_p3 = scmp.lt.u32.totalorder %s1252_s17, %s1680_s10 }
  0x2a   :  { %p1258_p4 = pnand %p1256_p3, %p1253_p2 }
  0x2c   :  { %1261 = shalt.err (!%p1258_p4)
}
  0x2d   :  { %s1262_s5 = scalar_lea.vmem %s100_s24, 2048  ;;  %p1267_p6 = scmp.lt.s32.totalorder %s100_s24, %s100_s24 }
  0x2e   :  { %p1263_p5 = scmp.ne.s32.totalorder %s100_s24, %s1262_s5  ;;  %p1268_p7 = scmp.lt.s32.totalorder %s1262_s5, %s1262_s5 }
  0x30   :  { %p1269_p8 = por %p1268_p7, %p1267_p6 }
  0x32   :  { %p1270_p9 = pnand %p1269_p8, %p1263_p5 }
  0x34   :  { %1273 = shalt.err (!%p1270_p9)
}
  0x35   :  { %105 = dma.hbm_to_vmem [thread:$0]  %s1680_s10, 2048, %s100_s24, [#allocation12], %s1396_s25, %s1396_s25, %s1397_s26  }
  0x36   :  { %s1274_s23 = scalar_lea.hbm %s1670_s0, 256 }
  0x37   :  { %p1275_p10 = scmp.ne.s32.totalorder %s1670_s0, %s1274_s23  ;;  %p1278_p11 = scmp.lt.u32.totalorder %s1274_s23, %s1670_s0 }
  0x39   :  { %p1280_p12 = pnand %p1278_p11, %p1275_p10 }
  0x3b   :  { %1283 = shalt.err (!%p1280_p12)
}
  0x3c   :  { %s1284_s18 = scalar_lea.vmem %s1516_s28, 256  ;;  %p1289_p0 = scmp.lt.s32.totalorder %s1516_s28, %s1516_s28 }
  0x3d   :  { %p1285_p13 = scmp.ne.s32.totalorder %s1516_s28, %s1284_s18  ;;  %p1290_p1 = scmp.lt.s32.totalorder %s1284_s18, %s1284_s18 }
  0x3f   :  { %p1291_p2 = por %p1290_p1, %p1289_p0 }
  0x41   :  { %p1292_p3 = pnand %p1291_p2, %p1285_p13 }
  0x43   :  { %1295 = shalt.err (!%p1292_p3)
}
  0x44   :  { %35 = dma.hbm_to_vmem [thread:$0]  %s1670_s0, 256, %s1516_s28, [#allocation3], %s1396_s25, %s1396_s25, %s1397_s26  }
  0x45   :  { %s1400_s19 = smov [#allocation7]   ;;  %s1401_s21 = smov [#allocation10]  }
  0x46   :  { %s57_s20 = sshll.u32 %s1400_s19, 4  ;;  %s81_s5 = sshll.u32 %s1401_s21, 4  ;;  %s58_s20 = int_to_ptr.vmem [resolvable:$true] %s57_s20  ;;  %s1553_s5 = int_to_ptr.vmem [resolvable:$true] %s81_s5 }
  0x47   :  { %s1296_s1 = scalar_lea.hbm %s1674_s4, 2048 }
  0x48   :  { %p1297_p4 = scmp.ne.s32.totalorder %s1674_s4, %s1296_s1  ;;  %p1300_p5 = scmp.lt.u32.totalorder %s1296_s1, %s1674_s4 }
  0x4a   :  { %p1302_p6 = pnand %p1300_p5, %p1297_p4 }
  0x4c   :  { %1305 = shalt.err (!%p1302_p6)
}
  0x4d   :  { %s1306_s0 = scalar_lea.vmem %s58_s20, 2048  ;;  %p1311_p8 = scmp.lt.s32.totalorder %s58_s20, %s58_s20 }
  0x4e   :  { %p1307_p7 = scmp.ne.s32.totalorder %s58_s20, %s1306_s0  ;;  %p1312_p9 = scmp.lt.s32.totalorder %s1306_s0, %s1306_s0 }
  0x50   :  { %p1313_p10 = por %p1312_p9, %p1311_p8 }
  0x52   :  { %p1314_p11 = pnand %p1313_p10, %p1307_p7 }
  0x54   :  { %1317 = shalt.err (!%p1314_p11)
}
  0x55   :  { %63 = dma.hbm_to_vmem [thread:$0]  %s1674_s4, 2048, %s58_s20, [#allocation6], %s1396_s25, %s1396_s25, %s1397_s26  }
  0x56   :  { %s1318_s10 = scalar_lea.hbm %s1676_s6, 2048 }
  0x57   :  { %p1319_p12 = scmp.ne.s32.totalorder %s1676_s6, %s1318_s10  ;;  %p1322_p13 = scmp.lt.u32.totalorder %s1318_s10, %s1676_s6 }
  0x59   :  { %p1324_p0 = pnand %p1322_p13, %p1319_p12 }
  0x5b   :  { %1327 = shalt.err (!%p1324_p0)
}
  0x5c   :  { %s1328_s22 = scalar_lea.vmem %s1553_s5, 2048  ;;  %p1333_p2 = scmp.lt.s32.totalorder %s1553_s5, %s1553_s5 }
  0x5d   :  { %p1329_p1 = scmp.ne.s32.totalorder %s1553_s5, %s1328_s22  ;;  %p1334_p3 = scmp.lt.s32.totalorder %s1328_s22, %s1328_s22 }
  0x5f   :  { %p1335_p4 = por %p1334_p3, %p1333_p2 }
  0x61   :  { %p1336_p5 = pnand %p1335_p4, %p1329_p1 }
  0x63   :  { %1339 = shalt.err (!%p1336_p5)
}
  0x64   :  { %87 = dma.hbm_to_vmem [thread:$0]  %s1676_s6, 2048, %s1553_s5, [#allocation9], %s1396_s25, %s1396_s25, %s1397_s26  }
  0x65   :  { %s1402_s1 = smov [#allocation13]   ;;  %s1340_s29 = scalar_lea.hbm %s1682_s12, 2048 }
  0x66   :  { %s113_s30 = sshll.u32 %s1402_s1, 4  ;;  %p1341_p6 = scmp.ne.s32.totalorder %s1682_s12, %s1340_s29  ;;  %s114_s30 = int_to_ptr.vmem [resolvable:$true] %s113_s30 }
  0x67   :  { %p1344_p7 = scmp.lt.u32.totalorder %s1340_s29, %s1682_s12 }
  0x69   :  { %p1346_p8 = pnand %p1344_p7, %p1341_p6 }
  0x6b   :  { %1349 = shalt.err (!%p1346_p8)
}
  0x6c   :  { %s1350_s18 = scalar_lea.vmem %s114_s30, 2048  ;;  %p1355_p10 = scmp.lt.s32.totalorder %s114_s30, %s114_s30 }
  0x6d   :  { %p1351_p9 = scmp.ne.s32.totalorder %s114_s30, %s1350_s18  ;;  %p1356_p11 = scmp.lt.s32.totalorder %s1350_s18, %s1350_s18 }
  0x6f   :  { %p1357_p12 = por %p1356_p11, %p1355_p10 }
  0x71   :  { %p1358_p13 = pnand %p1357_p12, %p1351_p9 }
  0x73   :  { %1361 = shalt.err (!%p1358_p13)
}
  0x74   :  { %119 = dma.hbm_to_vmem [thread:$0]  %s1682_s12, 2048, %s114_s30, [#allocation12], %s1396_s25, %s1396_s25, %s1397_s26  }
  0x75   :  { %1384 = dma.done.wait [#allocation3], 256  }
  0x76   :  { %1385 = vsyncadd [#allocation3], 4294967040 }
  0x77   :  { %1386 = dma.done.wait [#allocation6], 2304  }
  0x78   :  { %1387 = vsyncadd [#allocation6], 4294964992 }
  0x79   :  { %1388 = dma.done.wait [#allocation9], 4096  }
  0x7a   :  { %1389 = vsyncadd [#allocation9], 4294963200 }
  0x7b   :  { %1390 = dma.done.wait [#allocation12], 4096  }
  0x7c   :  { %1391 = vsyncadd [#allocation12], 4294963200  ;;  %v1605_v0 = vld [vmem:[#allocation2] sm:$0xff]  ;;  %v1607_v1 = vld [vmem:[#allocation2 + $0x8] sm:$0xff]  ;;  %s1403_s1 = smov [#allocation14]  }
  0x7d   :  { %v259_v2 = vld [vmem:[#allocation8] sm:$0xff]  ;;  %457 = vadd.xlane.f32.xlu0 %v1605_v0  ;;  %v260_v3 = vld [vmem:[#allocation8 + $0x8] sm:$0xff]  ;;  %v261_v8 = vld [vmem:[#allocation8 + $0x10] sm:$0xff]  ;;  %s727_s30 = sshll.u32 %s1403_s1, 4  ;;  %s728_s30 = int_to_ptr.vmem [resolvable:$true] %s727_s30 }
  0x7e   :  { %v161_v4 = vld [vmem:[#allocation7] sm:$0xff]  ;;  %v162_v5 = vld [vmem:[#allocation7 + $0x8] sm:$0xff]  ;;  %v1050_v6 = vpack.c.bf16 %v260_v3, %v259_v2  ;;  %v262_v9 = vld [vmem:[#allocation8 + $0x18] sm:$0xff]  ;;  %v465_v3 = vlaneseq  ;;  %p1367_p1 = scmp.lt.s32.totalorder %s728_s30, %s728_s30 }
  0x7f   :  { %v1018_v7 = vpack.c.bf16 %v162_v5, %v161_v4  ;;  %v163_v10 = vld [vmem:[#allocation7 + $0x10] sm:$0xff]  ;;  %v1054_v11 = vpack.c.bf16 %v262_v9, %v261_v8  ;;  %v164_v12 = vld [vmem:[#allocation7 + $0x18] sm:$0xff]  ;;  %v263_v13 = vld [vmem:[#allocation8 + $0x20] sm:$0xff] }
  0x80   :  { %v264_v14 = vld [vmem:[#allocation8 + $0x28] sm:$0xff]  ;;  %1051 = vmatprep.subr.bf16.mxu1 %v1050_v6  ;;  %v1022_v15 = vpack.c.bf16 %v164_v12, %v163_v10  ;;  %v165_v16 = vld [vmem:[#allocation7 + $0x20] sm:$0xff]  ;;  %v265_v20 = vld [vmem:[#allocation8 + $0x30] sm:$0xff]  ;;  %v466_v4 = vand.u32 127, %v465_v3 }
  0x81   :  { %1019 = vmatprep.subr.bf16.mxu0 %v1018_v7  ;;  %v166_v17 = vld [vmem:[#allocation7 + $0x28] sm:$0xff]  ;;  %459 = vadd.xlane.f32.xlu0 %v1607_v1  ;;  %v1058_v18 = vpack.c.bf16 %v264_v14, %v263_v13  ;;  %v266_v21 = vld [vmem:[#allocation8 + $0x38] sm:$0xff]  ;;  %v167_v22 = vld [vmem:[#allocation7 + $0x30] sm:$0xff] }
  0x82   :  { %1053 = vmatpush3.bf16.msra.mxu1 %v1050_v6  ;;  %1021 = vmatpush3.bf16.msra.mxu0 %v1018_v7  ;;  %v1026_v19 = vpack.c.bf16 %v166_v17, %v165_v16  ;;  %v168_v23 = vld [vmem:[#allocation7 + $0x38] sm:$0xff]  ;;  %v1062_v24 = vpack.c.bf16 %v266_v21, %v265_v20  ;;  %v1611_v25 = vld [vmem:[#allocation5] sm:$0xff]  ;;  %v267_v27 = vld [vmem:[#allocation8 + $0x40] sm:$0xff]  ;;  %vm467_vm0 = vcmp.lt.s32.totalorder %v466_v4, 32 }
  0x83   :  { %1055 = vmatprep.subr.bf16.mxu1 %v1054_v11  ;;  %1023 = vmatprep.subr.bf16.mxu0 %v1022_v15  ;;  %v1030_v26 = vpack.c.bf16 %v168_v23, %v167_v22  ;;  %v268_v28 = vld [vmem:[#allocation8 + $0x48] sm:$0xff]  ;;  %v742_v29 = vmul.f32 -1.442695, %v1611_v25  ;;  %v146_v30 = vld [vmem:[#allocation5 + $0x8] sm:$0xff]  ;;  %v169_v31 = vld [vmem:[#allocation7 + $0x40] sm:$0xff] }
  0x84   :  { %v170_v32 = vld [vmem:[#allocation7 + $0x48] sm:$0xff]  ;;  %v743_v33 = vmul.f32 -1.442695, %v146_v30  ;;  %v1066_v34 = vpack.c.bf16 %v268_v28, %v267_v27  ;;  %v269_v36 = vld [vmem:[#allocation8 + $0x50] sm:$0xff]  ;;  %v270_v37 = vld [vmem:[#allocation8 + $0x58] sm:$0xff] }
  0x85   :  { %1188 = vpow2.f32 %v742_v29  ;;  %v1034_v35 = vpack.c.bf16 %v170_v32, %v169_v31  ;;  %v171_v38 = vld [vmem:[#allocation7 + $0x50] sm:$0xff]  ;;  %v172_v39 = vld [vmem:[#allocation7 + $0x58] sm:$0xff]  ;;  %v1070_v40 = vpack.c.bf16 %v270_v37, %v269_v36  ;;  %v271_v42 = vld [vmem:[#allocation8 + $0x60] sm:$0xff] }
  0x86   :  { %1057 = vmatpush3.bf16.msra.mxu1 %v1054_v11  ;;  %1025 = vmatpush3.bf16.msra.mxu0 %v1022_v15  ;;  %1190 = vpow2.f32 %v743_v33  ;;  %v1038_v41 = vpack.c.bf16 %v172_v39, %v171_v38  ;;  %v272_v43 = vld [vmem:[#allocation8 + $0x68] sm:$0xff]  ;;  %v173_v44 = vld [vmem:[#allocation7 + $0x60] sm:$0xff]  ;;  %v273_v49 = vld [vmem:[#allocation8 + $0x70] sm:$0xff] }
  0x87   :  { %1059 = vmatprep.subr.bf16.mxu1 %v1058_v18  ;;  %1027 = vmatprep.subr.bf16.mxu0 %v1026_v19  ;;  %v174_v45 = vld [vmem:[#allocation7 + $0x68] sm:$0xff]  ;;  %v1074_v46 = vpack.c.bf16 %v272_v43, %v271_v42  ;;  %v274_v50 = vld [vmem:[#allocation8 + $0x78] sm:$0xff]  ;;  %v175_v53 = vld [vmem:[#allocation7 + $0x70] sm:$0xff] }
  0x88   :  { %v1042_v48 = vpack.c.bf16 %v174_v45, %v173_v44  ;;  %v176_v54 = vld [vmem:[#allocation7 + $0x78] sm:$0xff]  ;;  %v1078_v56 = vpack.c.bf16 %v274_v50, %v273_v49  ;;  %v506_v58 = vld [vmem:[#allocation11] sm:$0xff]  ;;  %v507_v59 = vld [vmem:[#allocation11 + $0x8] sm:$0xff] }
  0x89   :  { %v1046_v57 = vpack.c.bf16 %v176_v54, %v175_v53  ;;  %v1114_v60 = vpack.c.bf16 %v507_v59, %v506_v58  ;;  %v508_v15 = vld [vmem:[#allocation11 + $0x10] sm:$0xff]  ;;  %v509_v16 = vld [vmem:[#allocation11 + $0x18] sm:$0xff]  ;;  %v519_v31 = vld [vmem:[#allocation11 + $0x68] sm:$0xff] }
  0x8a   :  { %1061 = vmatpush3.bf16.msra.mxu1 %v1058_v18  ;;  %1029 = vmatpush3.bf16.msra.mxu0 %v1026_v19  ;;  %v1118_v17 = vpack.c.bf16 %v509_v16, %v508_v15  ;;  %v510_v18 = vld [vmem:[#allocation11 + $0x20] sm:$0xff]  ;;  %v511_v19 = vld [vmem:[#allocation11 + $0x28] sm:$0xff]  ;;  %v512_v21 = vld [vmem:[#allocation11 + $0x30] sm:$0xff] }
  0x8b   :  { %1063 = vmatprep.subr.bf16.mxu1 %v1062_v24  ;;  %1031 = vmatprep.subr.bf16.mxu0 %v1030_v26  ;;  %v1122_v20 = vpack.c.bf16 %v511_v19, %v510_v18  ;;  %v513_v22 = vld [vmem:[#allocation11 + $0x38] sm:$0xff]  ;;  %v516_v27 = vld [vmem:[#allocation11 + $0x50] sm:$0xff]  ;;  %v357_v36 = vld [vmem:[#allocation10] sm:$0xff] }
  0x8c   :  { %v1126_v23 = vpack.c.bf16 %v513_v22, %v512_v21  ;;  %v517_v28 = vld [vmem:[#allocation11 + $0x58] sm:$0xff]  ;;  %v520_v33 = vld [vmem:[#allocation11 + $0x70] sm:$0xff]  ;;  %v358_v37 = vld [vmem:[#allocation10 + $0x8] sm:$0xff] }
  0x8d   :  { %v1134_v29 = vpack.c.bf16 %v517_v28, %v516_v27  ;;  %v359_v38 = vld [vmem:[#allocation10 + $0x10] sm:$0xff]  ;;  %v1082_v39 = vpack.c.bf16 %v358_v37, %v357_v36  ;;  %v361_v42 = vld [vmem:[#allocation10 + $0x20] sm:$0xff]  ;;  %v362_v43 = vld [vmem:[#allocation10 + $0x28] sm:$0xff] }
  0x8e   :  { %1065 = vmatpush3.bf16.msra.mxu1 %v1062_v24  ;;  %1033 = vmatpush3.bf16.msra.mxu0 %v1030_v26  ;;  %v514_v24 = vld [vmem:[#allocation11 + $0x40] sm:$0xff]  ;;  %v1090_v44 = vpack.c.bf16 %v362_v43, %v361_v42  ;;  %v363_v45 = vld [vmem:[#allocation10 + $0x30] sm:$0xff]  ;;  %v366_v49 = vld [vmem:[#allocation10 + $0x48] sm:$0xff] }
  0x8f   :  { %1067 = vmatprep.subr.bf16.mxu1 %v1066_v34  ;;  %1035 = vmatprep.subr.bf16.mxu0 %v1034_v35  ;;  %v1189_v47 = vpop.eup %1188  ;;  %v369_v54 = vld [vmem:[#allocation10 + $0x60] sm:$0xff]  ;;  %v372_v58 = vld [vmem:[#allocation10 + $0x78] sm:$0xff]  ;;  %v623_v37 = vld [vmem:[#allocation13 + $0x28] sm:$0xff] }
  0x90   :  { %v1191_v51 = vpop.eup %1190  ;;  %v153_v52 = vadd.f32 1.0, %v1189_v47  ;;  %v748_v15 = vld [vmem:[%s1673_s3] ss:$0 sm:$0xff]  ;;  %v627_v43 = vld [vmem:[#allocation13 + $0x48] sm:$0xff] }
  0x91   :  { %v154_v55 = vadd.f32 1.0, %v1191_v51  ;;  %v367_v51 = vld [vmem:[#allocation10 + $0x50] sm:$0xff]  ;;  %v744_v16 = vld [vmem:[%s1677_s7] ss:$0 sm:$0xff] }
  0x92   :  { %1069 = vmatpush3.bf16.msra.mxu1 %v1066_v34  ;;  %1037 = vmatpush3.bf16.msra.mxu0 %v1034_v35  ;;  %1192 = vrcp.f32 %v153_v52  ;;  %v521_v34 = vld [vmem:[#allocation11 + $0x78] sm:$0xff]  ;;  %v622_v36 = vld [vmem:[#allocation13 + $0x20] sm:$0xff] }
  0x93   :  { %1071 = vmatprep.subr.bf16.mxu1 %v1070_v40  ;;  %1039 = vmatprep.subr.bf16.mxu0 %v1038_v41  ;;  %1194 = vrcp.f32 %v154_v55  ;;  %v1142_v35 = vpack.c.bf16 %v521_v34, %v520_v33  ;;  %v368_v52 = vld [vmem:[#allocation10 + $0x58] sm:$0xff]  ;;  %v370_v55 = vld [vmem:[#allocation10 + $0x68] sm:$0xff]  ;;  %v620_v34 = vld [vmem:[#allocation13 + $0x10] sm:$0xff] }
  0x94   :  { %v1102_v53 = vpack.c.bf16 %v368_v52, %v367_v51  ;;  %v626_v42 = vld [vmem:[#allocation13 + $0x40] sm:$0xff]  ;;  %v632_v51 = vld [vmem:[#allocation13 + $0x70] sm:$0xff]  ;;  %v633_v52 = vld [vmem:[#allocation13 + $0x78] sm:$0xff] }
  0x96   :  { %1073 = vmatpush3.bf16.msra.mxu1 %v1070_v40  ;;  %1041 = vmatpush3.bf16.msra.mxu0 %v1038_v41  ;;  %v360_v40 = vld [vmem:[#allocation10 + $0x18] sm:$0xff] }
  0x97   :  { %1075 = vmatprep.subr.bf16.mxu1 %v1074_v46  ;;  %1043 = vmatprep.subr.bf16.mxu0 %v1042_v48  ;;  %v1086_v41 = vpack.c.bf16 %v360_v40, %v359_v38  ;;  %v1154_v38 = vpack.c.bf16 %v623_v37, %v622_v36  ;;  %v625_v40 = vld [vmem:[#allocation13 + $0x38] sm:$0xff] }
  0x9a   :  { %1077 = vmatpush3.bf16.msra.mxu1 %v1074_v46  ;;  %1045 = vmatpush3.bf16.msra.mxu0 %v1042_v48  ;;  %v364_v46 = vld [vmem:[#allocation10 + $0x38] sm:$0xff]  ;;  %v365_v48 = vld [vmem:[#allocation10 + $0x40] sm:$0xff] }
  0x9b   :  { %1079 = vmatprep.subr.bf16.mxu1 %v1078_v56  ;;  %1047 = vmatprep.subr.bf16.mxu0 %v1046_v57  ;;  %v1094_v47 = vpack.c.bf16 %v364_v46, %v363_v45  ;;  %v1098_v50 = vpack.c.bf16 %v366_v49, %v365_v48  ;;  %v628_v45 = vld [vmem:[#allocation13 + $0x50] sm:$0xff]  ;;  %v629_v46 = vld [vmem:[#allocation13 + $0x58] sm:$0xff]  ;;  %v630_v48 = vld [vmem:[#allocation13 + $0x60] sm:$0xff] }
  0x9c   :  { %v1193_v61 = vpop.eup %1192  ;;  %v631_v49 = vld [vmem:[#allocation13 + $0x68] sm:$0xff] }
  0x9d   :  { %v1195_v62 = vpop.eup %1194  ;;  %v159_v63 = vmul.f32 %v1193_v61, %v1611_v25  ;;  %v515_v25 = vld [vmem:[#allocation11 + $0x48] sm:$0xff] }
  0x9e   :  { %1081 = vmatpush3.bf16.msra.mxu1 %v1078_v56  ;;  %1049 = vmatpush3.bf16.msra.mxu0 %v1046_v57  ;;  %v1615_v2 = vmul.f32 %v1195_v62, %v146_v30  ;;  %v1130_v26 = vpack.c.bf16 %v515_v25, %v514_v24  ;;  %v518_v30 = vld [vmem:[#allocation11 + $0x60] sm:$0xff]  ;;  %v1106_v56 = vpack.c.bf16 %v370_v55, %v369_v54  ;;  %v371_v57 = vld [vmem:[#allocation10 + $0x70] sm:$0xff] }
  0x9f   :  { %1115 = vmatprep.subr.bf16.mxu1 %v1114_v60  ;;  %910 = vmatprep.mubr.f32.mxu1 %v159_v63  ;;  %v1138_v32 = vpack.c.bf16 %v519_v31, %v518_v30  ;;  %v1110_v59 = vpack.c.bf16 %v372_v58, %v371_v57  ;;  %v618_v31 = vld [vmem:[#allocation13] sm:$0xff] }
  0xa0   :  { %875 = vmatprep.mubr.f32.mxu0 %v159_v63  ;;  %1083 = vmatprep.subr.bf16.mxu0 %v1082_v39 }
  0xa1   :  { %911 = vmatmul.mubr.f32.vlgmr.msra.gmra.mrb[0].mxu1 %v1615_v2  ;;  %876 = vmatmul.mubr.f32.vlgmr.msra.gmra.mrb[0].mxu0 %v1615_v2 }
  0xa2   :  { %1117 = vmatpush3.bf16.msra.mxu1 %v1114_v60  ;;  %945 = vmatprep.mubr.f32.mxu0 %v159_v63 }
  0xa3   :  { %1119 = vmatprep.subr.bf16.mxu1 %v1118_v17  ;;  %1085 = vmatpush3.bf16.msra.mxu0 %v1082_v39  ;;  %v624_v39 = vld [vmem:[#allocation13 + $0x30] sm:$0xff] }
  0xa4   :  { %1087 = vmatprep.subr.bf16.mxu0 %v1086_v41 }
  0xa6   :  { %1121 = vmatpush3.bf16.msra.mxu1 %v1118_v17 }
  0xa7   :  { %1123 = vmatprep.subr.bf16.mxu1 %v1122_v20  ;;  %1089 = vmatpush3.bf16.msra.mxu0 %v1086_v41  ;;  %v1158_v41 = vpack.c.bf16 %v625_v40, %v624_v39 }
  0xa8   :  { %1091 = vmatprep.subr.bf16.mxu0 %v1090_v44 }
  0xaa   :  { %1125 = vmatpush3.bf16.msra.mxu1 %v1122_v20 }
  0xab   :  { %1127 = vmatprep.subr.bf16.mxu1 %v1126_v23  ;;  %1093 = vmatpush3.bf16.msra.mxu0 %v1090_v44  ;;  %v1162_v44 = vpack.c.bf16 %v627_v43, %v626_v42 }
  0xac   :  { %1095 = vmatprep.subr.bf16.mxu0 %v1094_v47 }
  0xae   :  { %1129 = vmatpush3.bf16.msra.mxu1 %v1126_v23 }
  0xaf   :  { %1131 = vmatprep.subr.bf16.mxu1 %v1130_v26  ;;  %1097 = vmatpush3.bf16.msra.mxu0 %v1094_v47  ;;  %v1166_v47 = vpack.c.bf16 %v629_v46, %v628_v45 }
  0xb0   :  { %1099 = vmatprep.subr.bf16.mxu0 %v1098_v50 }
  0xb2   :  { %1133 = vmatpush3.bf16.msra.mxu1 %v1130_v26 }
  0xb3   :  { %1135 = vmatprep.subr.bf16.mxu1 %v1134_v29  ;;  %1101 = vmatpush3.bf16.msra.mxu0 %v1098_v50  ;;  %v1170_v50 = vpack.c.bf16 %v631_v49, %v630_v48 }
  0xb4   :  { %1103 = vmatprep.subr.bf16.mxu0 %v1102_v53 }
  0xb6   :  { %1137 = vmatpush3.bf16.msra.mxu1 %v1134_v29 }
  0xb7   :  { %1139 = vmatprep.subr.bf16.mxu1 %v1138_v32  ;;  %1105 = vmatpush3.bf16.msra.mxu0 %v1102_v53  ;;  %v1174_v53 = vpack.c.bf16 %v633_v52, %v632_v51 }
  0xb8   :  { %1107 = vmatprep.subr.bf16.mxu0 %v1106_v56 }
  0xba   :  { %1141 = vmatpush3.bf16.msra.mxu1 %v1138_v32  ;;  %v619_v32 = vld [vmem:[#allocation13 + $0x8] sm:$0xff] }
  0xbb   :  { %1143 = vmatprep.subr.bf16.mxu1 %v1142_v35  ;;  %1109 = vmatpush3.bf16.msra.mxu0 %v1106_v56  ;;  %v1146_v33 = vpack.c.bf16 %v619_v32, %v618_v31  ;;  %v749_v56 = vld [vmem:[%s1681_s11] ss:$0 sm:$0xff] }
  0xbc   :  { %1111 = vmatprep.subr.bf16.mxu0 %v1110_v59 }
  0xbe   :  { %1145 = vmatpush3.bf16.msra.mxu1 %v1142_v35  ;;  %v621_v35 = vld [vmem:[#allocation13 + $0x18] sm:$0xff] }
  0xbf   :  { %1113 = vmatpush3.bf16.msra.mxu0 %v1110_v59 }
  0xc0   :  { %1147 = vmatprep.subr.bf16.mxu0 %v1146_v33 }
  0xc2   :  { %946 = vmatmul.mubr.f32.vlgmr.msra.gmra.mrb[2].mxu0 %v1615_v2  ;;  %v747_v2 = vld [vmem:[%s1672_s2] ss:$0 sm:$0xff] }
  0xc3   :  { %1149 = vmatpush3.bf16.msra.mxu0 %v1146_v33 }
 0x10a   :  { %v458_v5 = vpop.xlane.xlu0 %457 }
 0x10b   :  { %v461_v6 = vmul.f32 0.03125, %v458_v5 }
 0x10d   :  { %v463_v7 = vsub.f32 %v1605_v0, %v461_v6 }
 0x10e   :  { %v460_v8 = vpop.xlane.xlu0 %459 }
 0x10f   :  { %v462_v9 = vmul.f32 0.03125, %v460_v8  ;;  %v1620_v10 = vsel %vm467_vm0, %v463_v7, 0.0 }
 0x110   :  { %v470_v11 = vmul.f32 %v1620_v10, %v1620_v10 }
 0x111   :  { %v464_v12 = vsub.f32 %v1607_v1, %v462_v9  ;;  %v745_v9 = vld [vmem:[%s1678_s8] ss:$0 sm:$0xff] }
 0x112   :  { %472 = vadd.xlane.f32.xlu1 %v470_v11 }
 0x113   :  { %v1625_v13 = vsel %vm467_vm0, %v464_v12, 0.0 }
 0x114   :  { %v471_v14 = vmul.f32 %v1625_v13, %v1625_v13 }
 0x116   :  { %474 = vadd.xlane.f32.xlu1 %v471_v14 }
 0x174   :  { %v912_v60 = vpop.f32.mrb[0].mxu1  ;;  %v877_v61 = vpop.f32.mrb[0].mxu0 }
 0x175   :  { %v348_v62 = vpop.f32.mrb[1].mxu1  ;;  %v250_v63 = vpop.f32.mrb[1].mxu0  ;;  %v354_v20 = vadd.f32 %v912_v60, %v745_v9  ;;  %v256_v29 = vadd.f32 %v877_v61, %v744_v16 }
 0x176   :  { %v349_v11 = vadd.f32 %v745_v9, %v348_v62  ;;  %v251_v23 = vadd.f32 %v744_v16, %v250_v63 }
 0x178   :  { %v500_v18 = vadd.f32 1.0, %v349_v11  ;;  %v746_v11 = vld [vmem:[%s1679_s9] ss:$0 sm:$0xff]  ;;  %s1362_s9 = scalar_lea.vmem %s728_s30, 256 }
 0x179   :  { %p1363_p0 = scmp.ne.s32.totalorder %s728_s30, %s1362_s9  ;;  %p1368_p2 = scmp.lt.s32.totalorder %s1362_s9, %s1362_s9 }
 0x17b   :  { %p1369_p3 = por %p1368_p2, %p1367_p1 }
 0x17d   :  { %p1370_p4 = pnand %p1369_p3, %p1363_p0 }
 0x195   :  { %v947_v54 = vpop.f32.mrb[2].mxu0 }
 0x196   :  { %v446_v55 = vpop.f32.mrb[3].mxu0 }
 0x19f   :  { %v473_v3 = vpop.xlane.xlu1 %472 }
 0x1a0   :  { %v476_v4 = vmul.f32 0.03125, %v473_v3 }
 0x1a2   :  { %v478_v5 = vadd.f32 1e-06, %v476_v4 }
 0x1a3   :  { %v475_v6 = vpop.xlane.xlu1 %474 }
 0x1a4   :  { %1196 = vrsqrt.f32 %v478_v5  ;;  %v477_v7 = vmul.f32 0.03125, %v475_v6 }
 0x1a6   :  { %v479_v8 = vadd.f32 1e-06, %v477_v7 }
 0x1a8   :  { %1198 = vrsqrt.f32 %v479_v8 }
 0x1ae   :  { %v1197_v12 = vpop.eup %1196 }
 0x1af   :  { %v482_v14 = vmul.f32 %v1197_v12, %v1620_v10  ;;  %v501_v10 = vadd.f32 1.0, %v354_v20  ;;  %v752_v12 = vld [vmem:[%s1683_s13] ss:$0 sm:$0xff] }
 0x1b1   :  { %v490_v17 = vmul.f32 %v747_v2, %v482_v14  ;;  %v452_v14 = vadd.f32 %v947_v54, %v746_v11 }
 0x1b2   :  { %v1199_v19 = vpop.eup %1198 }
 0x1b3   :  { %v483_v21 = vmul.f32 %v1199_v19, %v1625_v13  ;;  %v498_v22 = vadd.f32 %v748_v15, %v490_v17  ;;  %v1150_v13 = vpack.c.bf16 %v621_v35, %v620_v34  ;;  %v447_v17 = vadd.f32 %v746_v11, %v446_v55 }
 0x1b5   :  { %v491_v24 = vmul.f32 %v747_v2, %v483_v21  ;;  %v502_v25 = vmul.f32 %v500_v18, %v498_v22  ;;  %1151 = vmatprep.subr.bf16.mxu0 %v1150_v13 }
 0x1b6   :  { %1153 = vmatpush3.bf16.msra.mxu0 %v1150_v13 }
 0x1b7   :  { %v499_v26 = vadd.f32 %v748_v15, %v491_v24  ;;  %v504_v27 = vadd.f32 %v502_v25, %v251_v23  ;;  %1155 = vmatprep.subr.bf16.mxu0 %v1154_v38 }
 0x1b9   :  { %v503_v28 = vmul.f32 %v501_v10, %v499_v26  ;;  %980 = vmatprep.mubr.f32.mxu1 %v504_v27 }
 0x1ba   :  { %1157 = vmatpush3.bf16.msra.mxu0 %v1154_v38 }
 0x1bb   :  { %v505_v30 = vadd.f32 %v503_v28, %v256_v29  ;;  %1159 = vmatprep.subr.bf16.mxu0 %v1158_v41 }
 0x1bd   :  { %981 = vmatmul.mubr.f32.vlgmr.msra.gmra.mrb[2].mxu1 %v505_v30 }
 0x1be   :  { %1161 = vmatpush3.bf16.msra.mxu0 %v1158_v41 }
 0x1bf   :  { %1163 = vmatprep.subr.bf16.mxu0 %v1162_v44 }
 0x1c2   :  { %1165 = vmatpush3.bf16.msra.mxu0 %v1162_v44 }
 0x1c3   :  { %1167 = vmatprep.subr.bf16.mxu0 %v1166_v47 }
 0x1c6   :  { %1169 = vmatpush3.bf16.msra.mxu0 %v1166_v47 }
 0x1c7   :  { %1171 = vmatprep.subr.bf16.mxu0 %v1170_v50 }
 0x1ca   :  { %1173 = vmatpush3.bf16.msra.mxu0 %v1170_v50 }
 0x1cb   :  { %1175 = vmatprep.subr.bf16.mxu0 %v1174_v53 }
 0x1ce   :  { %1177 = vmatpush3.bf16.msra.mxu0 %v1174_v53 }
 0x290   :  { %v982_v57 = vpop.f32.mrb[2].mxu1 }
 0x291   :  { %v601_v58 = vadd.f32 %v982_v57, %v749_v56  ;;  %v595_v59 = vpop.f32.mrb[3].mxu1 }
 0x292   :  { %v596_v60 = vadd.f32 %v749_v56, %v595_v59 }
 0x293   :  { %v751_v61 = vmul.f32 -1.442695, %v601_v58 }
 0x294   :  { %v750_v62 = vmul.f32 -1.442695, %v596_v60 }
 0x295   :  { %1200 = vpow2.f32 %v751_v61 }
 0x296   :  { %1202 = vpow2.f32 %v750_v62 }
 0x29f   :  { %v1201_v63 = vpop.eup %1200 }
 0x2a0   :  { %v1203_v3 = vpop.eup %1202  ;;  %v611_v4 = vadd.f32 1.0, %v1201_v63 }
 0x2a1   :  { %v610_v5 = vadd.f32 1.0, %v1203_v3 }
 0x2a2   :  { %1204 = vrcp.f32 %v611_v4 }
 0x2a3   :  { %1206 = vrcp.f32 %v610_v5 }
 0x2ac   :  { %v1205_v6 = vpop.eup %1204 }
 0x2ad   :  { %v1207_v7 = vpop.eup %1206  ;;  %v617_v9 = vmul.f32 %v1205_v6, %v601_v58 }
 0x2ae   :  { %v616_v8 = vmul.f32 %v1207_v7, %v596_v60 }
 0x2b0   :  { %1015 = vmatprep.mubr.f32.mxu0 %v616_v8 }
 0x2b1   :  { %1016 = vmatmul.mubr.f32.vlgmr.msra.gmra.mrb[4].mxu0 %v617_v9 }
 0x384   :  { %v1017_v2 = vpop.f32.mrb[4].mxu0 }
 0x385   :  { %v713_v15 = vadd.f32 %v1017_v2, %v752_v12  ;;  %v707_v16 = vpop.f32.mrb[5].mxu0 }
 0x386   :  { %v708_v18 = vadd.f32 %v752_v12, %v707_v16 }
 0x387   :  { %v717_v19 = vmul.f32 %v713_v15, %v452_v14 }
 0x388   :  { %v716_v20 = vmul.f32 %v708_v18, %v447_v17 }
 0x389   :  { %v719_v21 = vadd.f32 %v717_v19, %v1607_v1 }
 0x38a   :  { %v718_v22 = vadd.f32 %v716_v20, %v1605_v0 }
 0x38b   :  { %721 = vst [vmem:[#allocation14 + $0x8] sm:$0xff] %v719_v21 }
 0x38c   :  { %720 = vst [vmem:[#allocation14] sm:$0xff] %v718_v22 }
 0x38d   :  { %1373 = shalt.err (!%p1370_p4)
}
 0x38e   :  { %s1374_s27 = scalar_lea.hbm %s1684_s14, 256 }
 0x38f   :  { %p1375_p5 = scmp.ne.s32.totalorder %s1684_s14, %s1374_s27  ;;  %p1378_p6 = scmp.lt.u32.totalorder %s1374_s27, %s1684_s14 }
 0x391   :  { %p1380_p7 = pnand %p1378_p6, %p1375_p5 }
 0x393   :  { %1383 = shalt.err (!%p1380_p7)
}
 0x394   :  { %733 = dma.vmem_to_hbm [thread:$0]  %s728_s30, 256, %s1684_s14, [#allocation4], %s1396_s25, %s1396_s25, %s1397_s26  }
 0x395   :  { %1392 = dma.done.wait [#allocation4], 256  }
 0x396   :  { %1393 = vsyncadd [#allocation4], 4294967040 }
 0x397   :  { %737 = vsyncpa [#allocation3], 1 }
 0x398   :  { %738 = vsyncpa [#allocation6], 1 }
 0x399   :  { %739 = vsyncpa [#allocation9], 1 }
 0x39a   :  { %740 = vsyncpa [#allocation12], 1 }
 0x39b   :  { %741 = vsyncpa [#allocation4], 1 }

</bundles_post_ra>
